<compile_context>
chip_gen: v7x
topology: tpu7x:2x2x1
jax: 0.10.0
libtpu: 0.0.40
codegen_flags: <defaults>
</compile_context>

<pallas_src>
import functools

import jax
import jax.numpy as jnp
from jax.experimental import pallas as pl
from jax.experimental.pallas import tpu as pltpu

# quantization parameters (module __init__ args), mirroring the test:
#   scale=0.1, zero_point=10, dtype=torch.quint8
SCALE = 0.1
ZERO_POINT = 10
QMIN, QMAX = 0, 255  # torch.quint8 range

_LANE = 128
# ~4 MiB input block: in+out, double-buffered ~= 16-24 MiB VMEM; covered by a
# usage-derived vmem_limit_bytes so it is safe on v5e (16 MiB default scoped
# VMEM) and leaves headroom on v7x (64 MiB physical VMEM per TC).
_TARGET_BLOCK_BYTES = 4 << 20


def _quant_dequant_kernel(x_ref, o_ref, *, inv_scale, scale, zero_point, qmin, qmax):
    # Widen to f32 on the VPU (free under the HBM stream). jnp.round is
    # round-half-to-even (matches torch's nearbyint); round BEFORE adding the
    # zero_point, like torch.quantize_per_tensor, so tie-breaking matches.
    x = x_ref[...].astype(jnp.float32)
    q = jnp.round(x * inv_scale) + zero_point
    q = jnp.clip(q, qmin, qmax)
    o_ref[...] = ((q - zero_point) * scale).astype(o_ref.dtype)


def _round_up(a, b):
    return -(-a // b) * b


def _num_tensorcores():
    """Best-effort count of TensorCores behind one JAX device (1 or 2)."""
    try:
        kind = jax.devices()[0].device_kind.lower()
    except Exception:
        return 1
    # 2 TCs per chip (megacore / dual-TC parts): v4, v5p, v7x. v5e/v6e are 1 TC.
    if "v7" in kind or "v4" in kind or "v5p" in kind:
        return 2
    return 1


def _choose_tile_rows(rows, itemsize, num_tc):
    """Pick a lane-dense tile height for a (rows, 128) slab.

    - single full-array block for small/medium inputs on 1-TC parts (v5e/v6e):
      a grid split there is pure per-step overhead,
    - >= num_tc (balanced) grid steps on 2-TC parts (v7x) so both cores stream,
    - ~4 MiB blocks for large inputs; no requirement that the tile divides
      `rows` (cdiv grid + masked ragged final block).
    """
    sublane_mult = max(8, 32 // itemsize)
    target = max(
        sublane_mult,
        (_TARGET_BLOCK_BYTES // (_LANE * itemsize)) // sublane_mult * sublane_mult,
    )

    if rows <= target:
        if num_tc > 1 and rows >= 2 * sublane_mult:
            # split across the TensorCores; keep the tile sublane-aligned
            return _round_up(pl.cdiv(rows, num_tc), sublane_mult)
        return rows  # one block == full array dims (always a legal BlockSpec)

    tile = target
    if num_tc > 1:
        steps = pl.cdiv(rows, tile)
        if steps % num_tc:
            # avoid an odd trailing block leaving one TC idle for the tail
            steps = _round_up(steps, num_tc)
            tile = max(sublane_mult, _round_up(pl.cdiv(rows, steps), sublane_mult))
    return tile


def quantize_dequantize(x, scale=SCALE, zero_point=ZERO_POINT, qmin=QMIN, qmax=QMAX):
    """Fake-quantize (quantize_per_tensor -> dequantize) of a float tensor."""
    orig_shape = x.shape
    in_dtype = x.dtype
    out_dtype = jnp.float32  # torch.dequantize always returns float32
    in_itemsize = jnp.dtype(in_dtype).itemsize
    out_itemsize = jnp.dtype(out_dtype).itemsize

    flat = x.reshape(-1)
    n = flat.shape[0]
    rem = n % _LANE
    if rem:
        # Only when numel is not a multiple of 128 (never for NCHW test shapes):
        # pad a single partial lane row so the slab reshape is possible.
        flat = jnp.pad(flat, (0, _LANE - rem))
    rows = flat.shape[0] // _LANE
    x2d = flat.reshape(rows, _LANE)  # native dtype end-to-end, no f32 copy

    num_tc = _num_tensorcores()
    tile_rows = _choose_tile_rows(rows, in_itemsize, num_tc)
    grid = (pl.cdiv(rows, tile_rows),)  # ragged final block handled by masking

    # VMEM: ~2 buffers x (input block + output block) + headroom.
    block_bytes = tile_rows * _LANE * (in_itemsize + out_itemsize)
    vmem_limit = min(64 << 20, max(8 << 20, _round_up(2 * block_bytes + (4 << 20), 1 << 20)))

    kernel = functools.partial(
        _quant_dequant_kernel,
        inv_scale=float(1.0 / scale),
        scale=float(scale),
        zero_point=float(zero_point),
        qmin=float(qmin),
        qmax=float(qmax),
    )

    cost = pl.CostEstimate(
        flops=8 * rows * _LANE,
        transcendentals=0,
        bytes_accessed=rows * _LANE * (in_itemsize + out_itemsize),
    )

    out2d = pl.pallas_call(
        kernel,
        out_shape=jax.ShapeDtypeStruct((rows, _LANE), out_dtype),
        grid_spec=pltpu.PrefetchScalarGridSpec(
            num_scalar_prefetch=0,
            grid=grid,
            in_specs=[pl.BlockSpec((tile_rows, _LANE), lambda i: (i, 0))],
            out_specs=pl.BlockSpec((tile_rows, _LANE), lambda i: (i, 0)),
        ),
        compiler_params=pltpu.CompilerParams(
            dimension_semantics=("parallel",),
            vmem_limit_bytes=vmem_limit,
        ),
        cost_estimate=cost,
    )(x2d)

    out_flat = out2d.reshape(-1)
    if rem:
        out_flat = out_flat[:n]
    return out_flat.reshape(orig_shape)


def _reference(x, scale=SCALE, zero_point=ZERO_POINT, qmin=QMIN, qmax=QMAX):
    inv_scale = 1.0 / scale
    q = jnp.round(x.astype(jnp.float32) * inv_scale) + zero_point
    q = jnp.clip(q, qmin, qmax)
    return ((q - zero_point) * scale).astype(jnp.float32)


if __name__ == "__main__":
    key = jax.random.PRNGKey(0)
    # NCHW input, small shape consistent with the test module.
    x = jax.random.normal(key, (2, 4, 16, 16), dtype=jnp.float32) * 5.0

    y = quantize_dequantize(x)
    y = jax.block_until_ready(y)

    y_ref = _reference(x)
    assert y.shape == x.shape and y.dtype == jnp.float32
    assert jnp.allclose(y, y_ref, atol=1e-6), "mismatch vs reference"
    print("KERNEL_OK")
</pallas_src>

<mosaic_0001>
module attributes {stable_mosaic.version = 11 : i64} {
  func.func @_quant_dequant_kernel(%arg0: i32, %arg1: memref<16x128xf32, #tpu.memory_space<vmem>>, %arg2: memref<16x128xf32, #tpu.memory_space<vmem>>) attributes {dimension_semantics = [#tpu.dimension_semantics<parallel>], iteration_bounds = array<i64: 1>, scalar_prefetch = 0 : i64, scratch_operands = 0 : i64, tpu.core_type = #tpu.core_type<tc>, window_params = [{transform_indices = @transform_0, window_bounds = array<i64: 16, 128>}, {transform_indices = @transform_1, window_bounds = array<i64: 16, 128>}]} {
    %c0 = arith.constant 0 : index
    %c0_0 = arith.constant 0 : index
    %0 = vector.load %arg1[%c0, %c0_0] : memref<16x128xf32, #tpu.memory_space<vmem>>, vector<16x128xf32>
    %cst = arith.constant 1.000000e+01 : f32
    %1 = vector.broadcast %cst : f32 to vector<16x128xf32>
    %2 = arith.mulf %0, %1 : vector<16x128xf32>
    %3 = math.roundeven %2 : vector<16x128xf32>
    %cst_1 = arith.constant 1.000000e+01 : f32
    %4 = vector.broadcast %cst_1 : f32 to vector<16x128xf32>
    %5 = arith.addf %3, %4 : vector<16x128xf32>
    %cst_2 = arith.constant 0.000000e+00 : f32
    %cst_3 = arith.constant 2.550000e+02 : f32
    %6 = vector.broadcast %cst_2 : f32 to vector<16x128xf32>
    %7 = arith.maximumf %6, %5 : vector<16x128xf32>
    %8 = vector.broadcast %cst_3 : f32 to vector<16x128xf32>
    %9 = arith.minimumf %8, %7 : vector<16x128xf32>
    %cst_4 = arith.constant 1.000000e+01 : f32
    %10 = vector.broadcast %cst_4 : f32 to vector<16x128xf32>
    %11 = arith.subf %9, %10 : vector<16x128xf32>
    %cst_5 = arith.constant 1.000000e-01 : f32
    %12 = vector.broadcast %cst_5 : f32 to vector<16x128xf32>
    %13 = arith.mulf %11, %12 : vector<16x128xf32>
    %c0_6 = arith.constant 0 : index
    %c0_7 = arith.constant 0 : index
    %14 = vector.load %arg2[%c0_6, %c0_7] : memref<16x128xf32, #tpu.memory_space<vmem>>, vector<16x128xf32>
    tpu.vector_store %arg2[%c0_6, %c0_7], %13 {strides = array<i32>} : memref<16x128xf32, #tpu.memory_space<vmem>>, vector<16x128xf32>,
    return
  }
  func.func @transform_0(%arg0: i32) -> (i32, i32) {
    %c0_i32 = arith.constant 0 : i32
    %c0_i32_0 = arith.constant 0 : i32
    return %arg0, %c0_i32 : i32, i32
  }
  func.func @transform_1(%arg0: i32) -> (i32, i32) {
    %c0_i32 = arith.constant 0 : i32
    %c0_i32_0 = arith.constant 0 : i32
    return %arg0, %c0_i32 : i32, i32
  }
}

</mosaic_0001>

<bundles_post_ra>
// kernel: tpu_custom_call.1
= control target key start
LH: loop header
LB: loop body
LE: loop exit
PB: predicated region body
PF: predicated region fallthrough
CT: control target
= control target key end

     0   :  { %6 = vsyncpa [#allocation3], 0  ;;  %s158_s0 = inlined_call_operand.hbm [shape: f32[16,128], index: 0, kind: input, shape index: {}]   ;;  %s159_s1 = inlined_call_operand.hbm [shape: f32[16,128], index: 1, kind: output, shape index: {}]  }
   0x1   :  { %7 = vsyncpa [#allocation4], 0  ;;  %s114_s6 = smov [#allocation2]   ;;  %s66_s10 = scalar_lea.hbm %s158_s0, 256 }
   0x2   :  { %s13_s7 = sshll.u32 %s114_s6, 4  ;;  %p67_p0 = scmp.ne.s32.totalorder %s158_s0, %s66_s10  ;;  %s14_s7 = int_to_ptr.vmem [resolvable:$true] %s13_s7 }
   0x3   :  { %p70_p1 = scmp.lt.u32.totalorder %s66_s10, %s158_s0 }
   0x5   :  { %p72_p2 = pnand %p70_p1, %p67_p0 }
   0x7   :  { %75 = shalt.err (!%p72_p2)
}
   0x8   :  { %s76_s15 = scalar_lea.vmem %s14_s7, 256  ;;  %p81_p4 = scmp.lt.s32.totalorder %s14_s7, %s14_s7 }
   0x9   :  { %p77_p3 = scmp.ne.s32.totalorder %s14_s7, %s76_s15  ;;  %p82_p5 = scmp.lt.s32.totalorder %s76_s15, %s76_s15 }
   0xb   :  { %p83_p6 = por %p82_p5, %p81_p4 }
   0xd   :  { %p84_p7 = pnand %p83_p6, %p77_p3 }
   0xf   :  { %87 = shalt.err (!%p84_p7)
}
  0x10   :  { %s115_s16 = smov 128   ;;  %s116_s17 = smov 8  }
  0x11   :  { %19 = dma.hbm_to_vmem [thread:$0]  %s158_s0, 256, %s14_s7, [#allocation3], %s115_s16, %s115_s16, %s116_s17  }
  0x12   :  { %110 = dma.done.wait [#allocation3], 256  }
  0x13   :  { %111 = vsyncadd [#allocation3], 4294967040  ;;  %v23_v0 = vld [vmem:[#allocation2] sm:$0xff]  ;;  %v24_v1 = vld [vmem:[#allocation2 + $0x8] sm:$0xff]  ;;  %s117_s20 = smov [#allocation5]  }
  0x14   :  { %v25_v2 = vmul.f32 10.0, %v23_v0  ;;  %v26_v3 = vmul.f32 10.0, %v24_v1  ;;  %s46_s21 = sshll.u32 %s117_s20, 4  ;;  %s47_s21 = int_to_ptr.vmem [resolvable:$true] %s46_s21 }
  0x15   :  { %s88_s0 = scalar_lea.vmem %s47_s21, 256  ;;  %p93_p9 = scmp.lt.s32.totalorder %s47_s21, %s47_s21 }
  0x16   :  { %v60_v4 = vround.rtne.f32 %v25_v2  ;;  %v61_v5 = vround.rtne.f32 %v26_v3  ;;  %p89_p8 = scmp.ne.s32.totalorder %s47_s21, %s88_s0  ;;  %p94_p10 = scmp.lt.s32.totalorder %s88_s0, %s88_s0 }
  0x18   :  { %v29_v6 = vadd.f32 10.0, %v60_v4  ;;  %v30_v7 = vadd.f32 10.0, %v61_v5  ;;  %p95_p11 = por %p94_p10, %p93_p9 }
  0x1a   :  { %v31_v8 = vmax.f32 %v29_v6, 0.0  ;;  %v32_v9 = vmax.f32 %v30_v7, 0.0  ;;  %p96_p12 = pnand %p95_p11, %p89_p8 }
  0x1c   :  { %v33_v10 = vmin.f32 %v31_v8, 255.0  ;;  %v34_v11 = vmin.f32 %v32_v9, 255.0 }
  0x1e   :  { %v58_v12 = vadd.f32 -10.0, %v33_v10  ;;  %v59_v13 = vadd.f32 -10.0, %v34_v11 }
  0x20   :  { %v37_v14 = vmul.f32 0.1, %v58_v12  ;;  %v38_v15 = vmul.f32 0.1, %v59_v13 }
  0x22   :  { %39 = vst [vmem:[#allocation5] sm:$0xff] %v37_v14  ;;  %40 = vst [vmem:[#allocation5 + $0x8] sm:$0xff] %v38_v15 }
  0x23   :  { %99 = shalt.err (!%p96_p12)
}
  0x24   :  { %s100_s24 = scalar_lea.hbm %s159_s1, 256 }
  0x25   :  { %p101_p13 = scmp.ne.s32.totalorder %s159_s1, %s100_s24  ;;  %p104_p0 = scmp.lt.u32.totalorder %s100_s24, %s159_s1 }
  0x27   :  { %p106_p1 = pnand %p104_p0, %p101_p13 }
  0x29   :  { %109 = shalt.err (!%p106_p1)
}
  0x2a   :  { %52 = dma.vmem_to_hbm [thread:$0]  %s47_s21, 256, %s159_s1, [#allocation4], %s115_s16, %s115_s16, %s116_s17  }
  0x2b   :  { %112 = dma.done.wait [#allocation4], 256  }
  0x2c   :  { %113 = vsyncadd [#allocation4], 4294967040 }
  0x2d   :  { %56 = vsyncpa [#allocation3], 1 }
  0x2e   :  { %57 = vsyncpa [#allocation4], 1 }

</bundles_post_ra>
